<compile_context>
chip_gen: v5e
topology: v5e:2x2
jax: 0.10.0
libtpu: 0.0.40
codegen_flags: <defaults>
</compile_context>

<pallas_src>
import jax
import jax.numpy as jnp
from jax.experimental import pallas as pl
from jax.experimental.pallas import tpu as pltpu  # noqa: F401  (kept for parity with other modules)


def noar_forward(x):
    """NoAr.forward(x) == x.

    Recommended path: pure identity.  There is no compute and no data
    movement, so emitting any custom call would only add dispatch overhead and
    an optimization barrier (see perf review).  Callers composing Pallas
    pipelines should simply pass their refs/arrays through.
    """
    return x


def _noar_copy_kernel(x_ref, o_ref):
    # Single whole-array block resident in VMEM: one read, one write.
    o_ref[...] = x_ref[...]


def noar_forward_pallas(x):
    """Optional Pallas-boundary variant of NoAr (explicit kernel).

    Only use this when a standalone pallas_call boundary is required for
    module-composition reasons; otherwise prefer `noar_forward` (zero cost).
    The full array is mapped as one block (block_shape == array shape, which
    satisfies the (8,128) rule by using full dims), so there is no grid loop
    and no tiling decision to make.
    """
    ndim = x.ndim
    full_block = pl.BlockSpec(x.shape, lambda: (0,) * ndim)
    return pl.pallas_call(
        _noar_copy_kernel,
        out_shape=jax.ShapeDtypeStruct(x.shape, x.dtype),
        in_specs=[full_block],
        out_specs=full_block,
    )(x)


if __name__ == "__main__":
    key = jax.random.PRNGKey(0)
    # Shapes consistent with a CPC AR-module input: (batch=2, seq=8, hidden=32)
    x = jax.random.normal(key, (2, 8, 32), dtype=jnp.float32)

    # Primary (recommended) path: pure identity.
    y = noar_forward(x)

    # Pallas-boundary variant: run the kernel once to validate it compiles/runs.
    y_kernel = noar_forward_pallas(x)

    jax.block_until_ready((y, y_kernel))

    assert y.shape == x.shape and y.dtype == x.dtype
    assert bool(jnp.all(y == x))
    assert y_kernel.shape == x.shape and y_kernel.dtype == x.dtype
    assert bool(jnp.all(y_kernel == x))
    print("KERNEL_OK")
</pallas_src>

<mosaic_0001>
module attributes {stable_mosaic.version = 11 : i64} {
  func.func @_noar_copy_kernel(%arg0: memref<2x8x32xf32, #tpu.memory_space<vmem>>, %arg1: memref<2x8x32xf32, #tpu.memory_space<vmem>>) attributes {dimension_semantics = [], scalar_prefetch = 0 : i64, scratch_operands = 0 : i64, tpu.core_type = #tpu.core_type<tc>} {
    %c0 = arith.constant 0 : index
    %c0_0 = arith.constant 0 : index
    %c0_1 = arith.constant 0 : index
    %0 = vector.load %arg0[%c0, %c0_0, %c0_1] : memref<2x8x32xf32, #tpu.memory_space<vmem>>, vector<2x8x32xf32>
    %c0_2 = arith.constant 0 : index
    %c0_3 = arith.constant 0 : index
    %c0_4 = arith.constant 0 : index
    %1 = vector.load %arg1[%c0_2, %c0_3, %c0_4] : memref<2x8x32xf32, #tpu.memory_space<vmem>>, vector<2x8x32xf32>
    tpu.vector_store %arg1[%c0_2, %c0_3, %c0_4], %0 {strides = array<i32>} : memref<2x8x32xf32, #tpu.memory_space<vmem>>, vector<2x8x32xf32>,
    return
  }
}

</mosaic_0001>

<bundles_post_ra>
// kernel: tpu_custom_call.1
= control target key start
LH: loop header
LB: loop body
LE: loop exit
PB: predicated region body
PF: predicated region fallthrough
CT: control target
= control target key end

     0   :  { %6 = vsyncpa [#allocation3], 0  ;;  %s125_s0 = inlined_call_operand.hbm [shape: f32[2,8,32], index: 0, kind: input, shape index: {}]   ;;  %s126_s1 = inlined_call_operand.hbm [shape: f32[2,8,32], index: 1, kind: output, shape index: {}]  }
   0x1   :  { %7 = vsyncpa [#allocation4], 0  ;;  %s12_s8 = sshll.u32 %s125_s0, 4  ;;  %s105_s9 = smov [#allocation2]   ;;  %s13_s8 = int_to_ptr.hbm [resolvable:$true] %s12_s8 }
   0x2   :  { %s14_s10 = sshll.u32 %s105_s9, 4  ;;  %s106_s11 = smov 128   ;;  %s15_s10 = int_to_ptr.vmem [resolvable:$true] %s14_s10 }
   0x3   :  { %s107_s12 = smov 8  }
   0x4   :  { %20 = dma.hbm_to_vmem [thread:$0]  %s13_s8, 256, %s15_s10, [#allocation3], %s106_s11, %s106_s11, %s107_s12  }
   0x5   :  { %101 = dma.done.wait [#allocation3], 256  }
   0x6   :  { %102 = vsyncadd [#allocation3], 4294967040  ;;  %s108_s13 = smov [#allocation5]   ;;  %s36_s17 = sshll.u32 %s126_s1, 4  ;;  %vm27_vm0 = vcmask 261120   ;;  %v25_v0 = vld [vmem:[#allocation2] sm:$0xff]  ;;  %s37_s17 = int_to_ptr.hbm [resolvable:$true] %s36_s17 }
   0x7   :  { %s34_s14 = sshll.u32 %s108_s13, 4  ;;  %v26_v1 = vld [vmem:[#allocation2 + $0x8] sm:$0xff]  ;;  %28 = vst.msk [vmem:[#allocation5] sm:$0xff] %vm27_vm0, %v25_v0  ;;  %s35_s14 = int_to_ptr.vmem [resolvable:$true] %s34_s14 }
   0x8   :  { %29 = vst.msk [vmem:[#allocation5 + $0x8] sm:$0xff] %vm27_vm0, %v26_v1 }
   0x9   :  { %42 = dma.vmem_to_hbm [thread:$0]  %s35_s14, 256, %s37_s17, [#allocation4], %s106_s11, %s106_s11, %s107_s12  }
   0xa   :  { %103 = dma.done.wait [#allocation4], 256  }
   0xb   :  { %104 = vsyncadd [#allocation4], 4294967040 }
   0xc   :  { %47 = vsyncpa [#allocation3], 1 }
   0xd   :  { %48 = vsyncpa [#allocation4], 1 }

</bundles_post_ra>
